<compile_context>
chip_gen: v7x
topology: tpu7x:2x2x1
jax: 0.10.0
libtpu: 0.0.40
codegen_flags: <defaults>
</compile_context>

<pallas_src>
import functools

import jax
import jax.numpy as jnp
from jax.experimental import pallas as pl
from jax.experimental.pallas import tpu as pltpu

# Logical sizes (PyTorch module).
N_IN = 700
N_HIDDEN = 200
N_OUT = 256

# Padded, MXU/lane-friendly sizes.
N_IN_PAD = 768       # 700 -> 768  (6 * 128)
N_HID_PAD = 256      # 200 -> 256  (2 * 128)
N_HID_LAYERS = 4     # hidden1 .. hidden4


def _round_up(x, m):
    return (x + m - 1) // m * m


def mlp_kernel(x_ref, w_in_ref, w_hid_ref, w_out_ref, b_ref, o_ref):
    """Fused 6-layer MLP on one (TB, .) batch tile.

    x_ref     : (TB, 768)       bf16   (streamed per grid step)
    w_in_ref  : (768, 256)      bf16   (VMEM-resident across the grid)
    w_hid_ref : (4, 256, 256)   bf16   (VMEM-resident)
    w_out_ref : (256, 256)      bf16   (VMEM-resident)
    b_ref     : (6, 256)        f32    (row i = bias of layer i, zero-padded)
    o_ref     : (TB, 256)       f32
    """
    # Layer 0: 768 -> 256, ReLU.  bf16 MXU matmul, f32 accumulation.
    h = jnp.dot(x_ref[...], w_in_ref[...], preferred_element_type=jnp.float32)
    h = jnp.maximum(h + b_ref[pl.ds(0, 1), :], 0.0)

    # Hidden layers 1..4: 256 -> 256, ReLU.  (unrolled at trace time)
    for i in range(N_HID_LAYERS):
        h = jnp.dot(h.astype(jnp.bfloat16), w_hid_ref[i, :, :],
                    preferred_element_type=jnp.float32)
        h = jnp.maximum(h + b_ref[pl.ds(i + 1, 1), :], 0.0)

    # Output layer: 256 -> 256, no activation.
    out = jnp.dot(h.astype(jnp.bfloat16), w_out_ref[...],
                  preferred_element_type=jnp.float32)
    o_ref[...] = out + b_ref[pl.ds(5, 1), :]


def pack_params(params):
    """params: 6 (W, b) f32 pairs, W is (in, out), b is (out,).

    Returns (w_in, w_hid, w_out, biases): zero-padded to (768/256)-aligned
    shapes, weights cast to bf16, biases stacked and kept f32.
    """
    (w0, b0), (w1, b1), (w2, b2), (w3, b3), (w4, b4), (w5, b5) = params

    w_in = jnp.zeros((N_IN_PAD, N_HID_PAD), jnp.float32)
    w_in = w_in.at[:N_IN, :N_HIDDEN].set(w0)

    w_hid = jnp.zeros((N_HID_LAYERS, N_HID_PAD, N_HID_PAD), jnp.float32)
    for i, w in enumerate((w1, w2, w3, w4)):
        w_hid = w_hid.at[i, :N_HIDDEN, :N_HIDDEN].set(w)

    w_out = jnp.zeros((N_HID_PAD, N_OUT), jnp.float32)
    w_out = w_out.at[:N_HIDDEN, :].set(w5)

    biases = jnp.zeros((6, N_HID_PAD), jnp.float32)
    for i, b in enumerate((b0, b1, b2, b3, b4)):
        biases = biases.at[i, :N_HIDDEN].set(b.reshape(-1))
    biases = biases.at[5, :N_OUT].set(b5.reshape(-1))

    return (w_in.astype(jnp.bfloat16),
            w_hid.astype(jnp.bfloat16),
            w_out.astype(jnp.bfloat16),
            biases)


@functools.partial(jax.jit, static_argnames=("tb",))
def mlp_forward(x, packed, tb=256):
    """x: (B, 700) f32.  packed: output of pack_params.  Returns (B, 256) f32."""
    w_in, w_hid, w_out, biases = packed
    B = x.shape[0]
    # Batch tile: multiple of 16 (bf16 sublane packing); cap at `tb` (lane/VMEM
    # friendly on every generation; ~2 MiB of double-buffered activations at 256).
    TB = min(tb, _round_up(B, 16))
    Bp = _round_up(B, TB)

    # Pad batch + features with zeros; cast activations to bf16 (f32 accumulate
    # happens inside the kernel).
    x_pad = jnp.zeros((Bp, N_IN_PAD), jnp.float32).at[:B, :N_IN].set(x)
    x_pad = x_pad.astype(jnp.bfloat16)

    grid = (Bp // TB,)

    flops = 2 * Bp * (N_IN_PAD * N_HID_PAD
                      + N_HID_LAYERS * N_HID_PAD * N_HID_PAD
                      + N_HID_PAD * N_OUT)
    bytes_accessed = (x_pad.size * 2 + w_in.size * 2 + w_hid.size * 2
                      + w_out.size * 2 + biases.size * 4 + Bp * N_OUT * 4)

    out = pl.pallas_call(
        mlp_kernel,
        out_shape=jax.ShapeDtypeStruct((Bp, N_OUT), jnp.float32),
        grid_spec=pltpu.PrefetchScalarGridSpec(
            num_scalar_prefetch=0,
            grid=grid,
            in_specs=[
                # Activations: streamed / double-buffered per batch tile.
                pl.BlockSpec((TB, N_IN_PAD), lambda i: (i, 0)),
                # Weights & biases: constant block index -> DMA'd once, VMEM-resident.
                pl.BlockSpec((N_IN_PAD, N_HID_PAD), lambda i: (0, 0)),
                pl.BlockSpec((N_HID_LAYERS, N_HID_PAD, N_HID_PAD),
                             lambda i: (0, 0, 0)),
                pl.BlockSpec((N_HID_PAD, N_OUT), lambda i: (0, 0)),
                pl.BlockSpec((6, N_HID_PAD), lambda i: (0, 0)),
            ],
            out_specs=pl.BlockSpec((TB, N_OUT), lambda i: (i, 0)),
        ),
        compiler_params=pltpu.CompilerParams(
            dimension_semantics=("parallel",),
            vmem_limit_bytes=32 * 1024 * 1024,
        ),
        cost_estimate=pl.CostEstimate(flops=flops, transcendentals=0,
                                      bytes_accessed=bytes_accessed),
    )(x_pad, w_in, w_hid, w_out, biases)

    return out[:B]


def init_params(key):
    """Deterministic init mirroring nn.Linear shapes; biases 0 as in the module."""
    dims = [(N_IN, N_HIDDEN)] + [(N_HIDDEN, N_HIDDEN)] * 4 + [(N_HIDDEN, N_OUT)]
    params = []
    for din, dout in dims:
        key, sub = jax.random.split(key)
        bound = 1.0 / jnp.sqrt(din)  # PyTorch default uniform(-1/sqrt(fan_in), ...)
        w = jax.random.uniform(sub, (din, dout), jnp.float32, -bound, bound)
        b = jnp.zeros((dout,), jnp.float32)  # nn.init.constant_(bias, 0)
        params.append((w, b))
    return params


def mlp_reference_f32(x, params):
    h = x
    for i, (w, b) in enumerate(params):
        h = h @ w + b
        if i < len(params) - 1:
            h = jnp.maximum(h, 0.0)
    return h


def mlp_reference_bf16(x, packed):
    """Mirrors the kernel's bf16-operand / f32-accumulate arithmetic."""
    w_in, w_hid, w_out, biases = packed
    f32 = jnp.float32
    xb = jnp.zeros((x.shape[0], N_IN_PAD), f32).at[:, :N_IN].set(x)
    xb = xb.astype(jnp.bfloat16).astype(f32)
    h = jnp.maximum(xb @ w_in.astype(f32) + biases[0], 0.0)
    for i in range(N_HID_LAYERS):
        h = h.astype(jnp.bfloat16).astype(f32) @ w_hid[i].astype(f32) + biases[i + 1]
        h = jnp.maximum(h, 0.0)
    return h.astype(jnp.bfloat16).astype(f32) @ w_out.astype(f32) + biases[5]


if __name__ == "__main__":
    key = jax.random.PRNGKey(0)
    key, kx = jax.random.split(key)
    batch = 8
    x = jax.random.normal(kx, (batch, N_IN), jnp.float32)
    params = init_params(key)
    packed = pack_params(params)

    out = mlp_forward(x, packed)
    out = jax.block_until_ready(out)
    assert out.shape == (batch, N_OUT)

    # Tight check against a reference that mirrors the kernel's bf16/f32 arithmetic.
    ref_bf16 = mlp_reference_bf16(x, packed)
    assert jnp.allclose(out, ref_bf16, atol=2e-3, rtol=2e-2), \
        "mismatch vs bf16-mirror reference"

    # Loose sanity check against the pure-f32 reference (bf16 weights cost ~0.4%/layer).
    ref_f32 = mlp_reference_f32(x, params)
    rel_err = jnp.max(jnp.abs(out - ref_f32)) / (jnp.max(jnp.abs(ref_f32)) + 1e-12)
    assert rel_err < 5e-2, f"relative error vs f32 reference too large: {rel_err}"

    print("KERNEL_OK")
</pallas_src>

<mosaic_0001>
module attributes {stable_mosaic.version = 11 : i64} {
  func.func @mlp_kernel(%arg0: i32, %arg1: memref<16x768xbf16, #tpu.memory_space<vmem>>, %arg2: memref<768x256xbf16, #tpu.memory_space<vmem>>, %arg3: memref<4x256x256xbf16, #tpu.memory_space<vmem>>, %arg4: memref<256x256xbf16, #tpu.memory_space<vmem>>, %arg5: memref<6x256xf32, #tpu.memory_space<vmem>>, %arg6: memref<16x256xf32, #tpu.memory_space<vmem>>) attributes {dimension_semantics = [#tpu.dimension_semantics<parallel>], iteration_bounds = array<i64: 1>, scalar_prefetch = 0 : i64, scratch_operands = 0 : i64, tpu.core_type = #tpu.core_type<tc>, window_params = [{transform_indices = @transform_0, window_bounds = array<i64: 16, 768>}, {pipeline_mode = #tpu.pipeline_mode<synchronous>, transform_indices = @transform_1, window_bounds = array<i64: 768, 256>}, {pipeline_mode = #tpu.pipeline_mode<synchronous>, transform_indices = @transform_2, window_bounds = array<i64: 4, 256, 256>}, {pipeline_mode = #tpu.pipeline_mode<synchronous>, transform_indices = @transform_3, window_bounds = array<i64: 256, 256>}, {pipeline_mode = #tpu.pipeline_mode<synchronous>, transform_indices = @transform_4, window_bounds = array<i64: 6, 256>}, {transform_indices = @transform_5, window_bounds = array<i64: 16, 256>}]} {
    %c0 = arith.constant 0 : index
    %c0_0 = arith.constant 0 : index
    %0 = vector.load %arg1[%c0, %c0_0] : memref<16x768xbf16, #tpu.memory_space<vmem>>, vector<16x768xbf16>
    %c0_1 = arith.constant 0 : index
    %c0_2 = arith.constant 0 : index
    %1 = vector.load %arg2[%c0_1, %c0_2] : memref<768x256xbf16, #tpu.memory_space<vmem>>, vector<768x256xbf16>
    %cst = arith.constant dense<0.000000e+00> : vector<16x256xf32>
    %2 = tpu.matmul %0, %1, %cst {dimension_numbers = #tpu.dot_dimension_numbers<[1], [0], [0], [1], [0, 0, 1, 1], [], []>} : vector<16x768xbf16>, vector<768x256xbf16>, vector<16x256xf32> -> vector<16x256xf32>
    %c0_3 = arith.constant 0 : index
    %c0_4 = arith.constant 0 : index
    %3 = vector.load %arg5[%c0_3, %c0_4] : memref<6x256xf32, #tpu.memory_space<vmem>>, vector<1x256xf32>
    %4 = vector.broadcast %3 : vector<1x256xf32> to vector<16x256xf32>
    %5 = arith.addf %2, %4 : vector<16x256xf32>
    %cst_5 = arith.constant 0.000000e+00 : f32
    %6 = vector.broadcast %cst_5 : f32 to vector<16x256xf32>
    %7 = arith.maximumf %5, %6 : vector<16x256xf32>
    %8 = arith.truncf %7 : vector<16x256xf32> to vector<16x256xbf16>
    %c0_6 = arith.constant 0 : index
    %c0_7 = arith.constant 0 : index
    %c0_8 = arith.constant 0 : index
    %9 = vector.load %arg3[%c0_6, %c0_7, %c0_8] : memref<4x256x256xbf16, #tpu.memory_space<vmem>>, vector<1x256x256xbf16>
    %10 = vector.shape_cast %9 : vector<1x256x256xbf16> to vector<256x256xbf16>
    %cst_9 = arith.constant dense<0.000000e+00> : vector<16x256xf32>
    %11 = tpu.matmul %8, %10, %cst_9 {dimension_numbers = #tpu.dot_dimension_numbers<[1], [0], [0], [1], [0, 0, 1, 1], [], []>} : vector<16x256xbf16>, vector<256x256xbf16>, vector<16x256xf32> -> vector<16x256xf32>
    %c1 = arith.constant 1 : index
    %c0_10 = arith.constant 0 : index
    %12 = vector.load %arg5[%c1, %c0_10] : memref<6x256xf32, #tpu.memory_space<vmem>>, vector<1x256xf32>
    %13 = vector.broadcast %12 : vector<1x256xf32> to vector<16x256xf32>
    %14 = arith.addf %11, %13 : vector<16x256xf32>
    %cst_11 = arith.constant 0.000000e+00 : f32
    %15 = vector.broadcast %cst_11 : f32 to vector<16x256xf32>
    %16 = arith.maximumf %14, %15 : vector<16x256xf32>
    %17 = arith.truncf %16 : vector<16x256xf32> to vector<16x256xbf16>
    %c1_12 = arith.constant 1 : index
    %c0_13 = arith.constant 0 : index
    %c0_14 = arith.constant 0 : index
    %18 = vector.load %arg3[%c1_12, %c0_13, %c0_14] : memref<4x256x256xbf16, #tpu.memory_space<vmem>>, vector<1x256x256xbf16>
    %19 = vector.shape_cast %18 : vector<1x256x256xbf16> to vector<256x256xbf16>
    %cst_15 = arith.constant dense<0.000000e+00> : vector<16x256xf32>
    %20 = tpu.matmul %17, %19, %cst_15 {dimension_numbers = #tpu.dot_dimension_numbers<[1], [0], [0], [1], [0, 0, 1, 1], [], []>} : vector<16x256xbf16>, vector<256x256xbf16>, vector<16x256xf32> -> vector<16x256xf32>
    %c2 = arith.constant 2 : index
    %c0_16 = arith.constant 0 : index
    %21 = vector.load %arg5[%c2, %c0_16] : memref<6x256xf32, #tpu.memory_space<vmem>>, vector<1x256xf32>
    %22 = vector.broadcast %21 : vector<1x256xf32> to vector<16x256xf32>
    %23 = arith.addf %20, %22 : vector<16x256xf32>
    %cst_17 = arith.constant 0.000000e+00 : f32
    %24 = vector.broadcast %cst_17 : f32 to vector<16x256xf32>
    %25 = arith.maximumf %23, %24 : vector<16x256xf32>
    %26 = arith.truncf %25 : vector<16x256xf32> to vector<16x256xbf16>
    %c2_18 = arith.constant 2 : index
    %c0_19 = arith.constant 0 : index
    %c0_20 = arith.constant 0 : index
    %27 = vector.load %arg3[%c2_18, %c0_19, %c0_20] : memref<4x256x256xbf16, #tpu.memory_space<vmem>>, vector<1x256x256xbf16>
    %28 = vector.shape_cast %27 : vector<1x256x256xbf16> to vector<256x256xbf16>
    %cst_21 = arith.constant dense<0.000000e+00> : vector<16x256xf32>
    %29 = tpu.matmul %26, %28, %cst_21 {dimension_numbers = #tpu.dot_dimension_numbers<[1], [0], [0], [1], [0, 0, 1, 1], [], []>} : vector<16x256xbf16>, vector<256x256xbf16>, vector<16x256xf32> -> vector<16x256xf32>
    %c3 = arith.constant 3 : index
    %c0_22 = arith.constant 0 : index
    %30 = vector.load %arg5[%c3, %c0_22] : memref<6x256xf32, #tpu.memory_space<vmem>>, vector<1x256xf32>
    %31 = vector.broadcast %30 : vector<1x256xf32> to vector<16x256xf32>
    %32 = arith.addf %29, %31 : vector<16x256xf32>
    %cst_23 = arith.constant 0.000000e+00 : f32
    %33 = vector.broadcast %cst_23 : f32 to vector<16x256xf32>
    %34 = arith.maximumf %32, %33 : vector<16x256xf32>
    %35 = arith.truncf %34 : vector<16x256xf32> to vector<16x256xbf16>
    %c3_24 = arith.constant 3 : index
    %c0_25 = arith.constant 0 : index
    %c0_26 = arith.constant 0 : index
    %36 = vector.load %arg3[%c3_24, %c0_25, %c0_26] : memref<4x256x256xbf16, #tpu.memory_space<vmem>>, vector<1x256x256xbf16>
    %37 = vector.shape_cast %36 : vector<1x256x256xbf16> to vector<256x256xbf16>
    %cst_27 = arith.constant dense<0.000000e+00> : vector<16x256xf32>
    %38 = tpu.matmul %35, %37, %cst_27 {dimension_numbers = #tpu.dot_dimension_numbers<[1], [0], [0], [1], [0, 0, 1, 1], [], []>} : vector<16x256xbf16>, vector<256x256xbf16>, vector<16x256xf32> -> vector<16x256xf32>
    %c4 = arith.constant 4 : index
    %c0_28 = arith.constant 0 : index
    %39 = vector.load %arg5[%c4, %c0_28] : memref<6x256xf32, #tpu.memory_space<vmem>>, vector<1x256xf32>
    %40 = vector.broadcast %39 : vector<1x256xf32> to vector<16x256xf32>
    %41 = arith.addf %38, %40 : vector<16x256xf32>
    %cst_29 = arith.constant 0.000000e+00 : f32
    %42 = vector.broadcast %cst_29 : f32 to vector<16x256xf32>
    %43 = arith.maximumf %41, %42 : vector<16x256xf32>
    %44 = arith.truncf %43 : vector<16x256xf32> to vector<16x256xbf16>
    %c0_30 = arith.constant 0 : index
    %c0_31 = arith.constant 0 : index
    %45 = vector.load %arg4[%c0_30, %c0_31] : memref<256x256xbf16, #tpu.memory_space<vmem>>, vector<256x256xbf16>
    %cst_32 = arith.constant dense<0.000000e+00> : vector<16x256xf32>
    %46 = tpu.matmul %44, %45, %cst_32 {dimension_numbers = #tpu.dot_dimension_numbers<[1], [0], [0], [1], [0, 0, 1, 1], [], []>} : vector<16x256xbf16>, vector<256x256xbf16>, vector<16x256xf32> -> vector<16x256xf32>
    %c5 = arith.constant 5 : index
    %c0_33 = arith.constant 0 : index
    %47 = vector.load %arg5[%c5, %c0_33] : memref<6x256xf32, #tpu.memory_space<vmem>>, vector<1x256xf32>
    %48 = vector.broadcast %47 : vector<1x256xf32> to vector<16x256xf32>
    %49 = arith.addf %46, %48 : vector<16x256xf32>
    %c0_34 = arith.constant 0 : index
    %c0_35 = arith.constant 0 : index
    %50 = vector.load %arg6[%c0_34, %c0_35] : memref<16x256xf32, #tpu.memory_space<vmem>>, vector<16x256xf32>
    tpu.vector_store %arg6[%c0_34, %c0_35], %49 {strides = array<i32>} : memref<16x256xf32, #tpu.memory_space<vmem>>, vector<16x256xf32>,
    return
  }
  func.func @transform_0(%arg0: i32) -> (i32, i32) {
    %c0_i32 = arith.constant 0 : i32
    %c0_i32_0 = arith.constant 0 : i32
    return %arg0, %c0_i32 : i32, i32
  }
  func.func @transform_1(%arg0: i32) -> (i32, i32) {
    %c0_i32 = arith.constant 0 : i32
    %c0_i32_0 = arith.constant 0 : i32
    %c0_i32_1 = arith.constant 0 : i32
    return %c0_i32, %c0_i32_0 : i32, i32
  }
  func.func @transform_2(%arg0: i32) -> (i32, i32, i32) {
    %c0_i32 = arith.constant 0 : i32
    %c0_i32_0 = arith.constant 0 : i32
    %c0_i32_1 = arith.constant 0 : i32
    %c0_i32_2 = arith.constant 0 : i32
    return %c0_i32, %c0_i32_0, %c0_i32_1 : i32, i32, i32
  }
  func.func @transform_3(%arg0: i32) -> (i32, i32) {
    %c0_i32 = arith.constant 0 : i32
    %c0_i32_0 = arith.constant 0 : i32
    %c0_i32_1 = arith.constant 0 : i32
    return %c0_i32, %c0_i32_0 : i32, i32
  }
  func.func @transform_4(%arg0: i32) -> (i32, i32) {
    %c0_i32 = arith.constant 0 : i32
    %c0_i32_0 = arith.constant 0 : i32
    %c0_i32_1 = arith.constant 0 : i32
    return %c0_i32, %c0_i32_0 : i32, i32
  }
  func.func @transform_5(%arg0: i32) -> (i32, i32) {
    %c0_i32 = arith.constant 0 : i32
    %c0_i32_0 = arith.constant 0 : i32
    return %arg0, %c0_i32 : i32, i32
  }
}

</mosaic_0001>

<bundles_post_ra>
// kernel: mlp_forward.1
= control target key start
LH: loop header
LB: loop body
LE: loop exit
PB: predicated region body
PF: predicated region fallthrough
CT: control target
= control target key end

     0   :  { %10 = vsyncpa [#allocation3], 0  ;;  %s2995_s0 = inlined_call_operand.vmem [shape: bf16[16,768], index: 0, kind: input, shape index: {}]   ;;  %s2996_s1 = inlined_call_operand.hbm [shape: bf16[768,256], index: 1, kind: input, shape index: {}]   ;;  %s2997_s2 = inlined_call_operand.hbm [shape: bf16[4,256,256], index: 2, kind: input, shape index: {}]   ;;  %s2998_s3 = inlined_call_operand.hbm [shape: bf16[256,256], index: 3, kind: input, shape index: {}]   ;;  %s2999_s4 = inlined_call_operand.vmem [shape: f32[6,256], index: 4, kind: input, shape index: {}]   ;;  %s3000_s5 = inlined_call_operand.vmem [shape: f32[16,256], index: 5, kind: output, shape index: {}]  }
   0x1   :  { %11 = vsyncpa [#allocation5], 0  ;;  %s2844_s18 = smov [#allocation4]   ;;  %s2845_s20 = smov [#allocation2]  }
   0x2   :  { %s31_s19 = sshll.u32 %s2844_s18, 4  ;;  %s19_s21 = sshll.u32 %s2845_s20, 4  ;;  %s32_s19 = int_to_ptr.vmem [resolvable:$true] %s31_s19  ;;  %s2879_s21 = int_to_ptr.vmem [resolvable:$true] %s19_s21 }
   0x3   :  { %s2774_s24 = scalar_lea.hbm %s2997_s2, 16384 }
   0x4   :  { %p2775_p0 = scmp.ne.s32.totalorder %s2997_s2, %s2774_s24  ;;  %p2778_p1 = scmp.lt.u32.totalorder %s2774_s24, %s2997_s2 }
   0x6   :  { %p2780_p2 = pnand %p2778_p1, %p2775_p0 }
   0x8   :  { %2783 = shalt.err (!%p2780_p2)
}
   0x9   :  { %s2784_s29 = scalar_lea.vmem %s32_s19, 16384  ;;  %p2789_p4 = scmp.lt.s32.totalorder %s32_s19, %s32_s19 }
   0xa   :  { %p2785_p3 = scmp.ne.s32.totalorder %s32_s19, %s2784_s29  ;;  %p2790_p5 = scmp.lt.s32.totalorder %s2784_s29, %s2784_s29 }
   0xc   :  { %p2791_p6 = por %p2790_p5, %p2789_p4 }
   0xe   :  { %p2792_p7 = pnand %p2791_p6, %p2785_p3 }
  0x10   :  { %2795 = shalt.err (!%p2792_p7)
}
  0x11   :  { %s2846_s30 = smov 128   ;;  %s2847_s6 = smov 8  }
  0x12   :  { %37 = dma.hbm_to_vmem [thread:$0]  %s2997_s2, 16384, %s32_s19, [#allocation5], %s2846_s30, %s2846_s30, %s2847_s6  }
  0x13   :  { %s2796_s11 = scalar_lea.hbm %s2996_s1, 12288 }
  0x14   :  { %p2797_p8 = scmp.ne.s32.totalorder %s2996_s1, %s2796_s11  ;;  %p2800_p9 = scmp.lt.u32.totalorder %s2796_s11, %s2996_s1 }
  0x16   :  { %p2802_p10 = pnand %p2800_p9, %p2797_p8 }
  0x18   :  { %2805 = shalt.err (!%p2802_p10)
}
  0x19   :  { %s2806_s16 = scalar_lea.vmem %s2879_s21, 12288  ;;  %p2811_p12 = scmp.lt.s32.totalorder %s2879_s21, %s2879_s21 }
  0x1a   :  { %p2807_p11 = scmp.ne.s32.totalorder %s2879_s21, %s2806_s16  ;;  %p2812_p13 = scmp.lt.s32.totalorder %s2806_s16, %s2806_s16 }
  0x1c   :  { %p2813_p0 = por %p2812_p13, %p2811_p12 }
  0x1e   :  { %p2814_p1 = pnand %p2813_p0, %p2807_p11 }
  0x20   :  { %2817 = shalt.err (!%p2814_p1)
}
  0x21   :  { %25 = dma.hbm_to_vmem [thread:$0]  %s2996_s1, 12288, %s2879_s21, [#allocation3], %s2846_s30, %s2846_s30, %s2847_s6  }
  0x22   :  { %s2848_s18 = smov [#allocation6]   ;;  %s2818_s23 = scalar_lea.hbm %s2998_s3, 4096 }
  0x23   :  { %s43_s19 = sshll.u32 %s2848_s18, 4  ;;  %p2819_p2 = scmp.ne.s32.totalorder %s2998_s3, %s2818_s23  ;;  %s44_s19 = int_to_ptr.vmem [resolvable:$true] %s43_s19 }
  0x24   :  { %p2822_p3 = scmp.lt.u32.totalorder %s2818_s23, %s2998_s3 }
  0x26   :  { %p2824_p4 = pnand %p2822_p3, %p2819_p2 }
  0x28   :  { %2827 = shalt.err (!%p2824_p4)
}
  0x29   :  { %s2828_s28 = scalar_lea.vmem %s44_s19, 4096  ;;  %p2833_p6 = scmp.lt.s32.totalorder %s44_s19, %s44_s19 }
  0x2a   :  { %p2829_p5 = scmp.ne.s32.totalorder %s44_s19, %s2828_s28  ;;  %p2834_p7 = scmp.lt.s32.totalorder %s2828_s28, %s2828_s28 }
  0x2c   :  { %p2835_p8 = por %p2834_p7, %p2833_p6 }
  0x2e   :  { %p2836_p9 = pnand %p2835_p8, %p2829_p5 }
  0x30   :  { %2839 = shalt.err (!%p2836_p9)
}
  0x31   :  { %49 = dma.hbm_to_vmem [thread:$0]  %s2998_s3, 4096, %s44_s19, [#allocation5], %s2846_s30, %s2846_s30, %s2847_s6  }
  0x32   :  { %2840 = dma.done.wait [#allocation3], 12288  }
  0x33   :  { %2841 = vsyncadd [#allocation3], 4294955008 }
  0x34   :  { %2842 = dma.done.wait [#allocation5], 20480  }
  0x35   :  { %2843 = vsyncadd [#allocation5], 4294946816  ;;  %v2381_v0 = vld [vmem:[#allocation2 + $0x4] ss:$8 sps:$4 sm:$0xff]   ;;  %v2383_v1 = vld [vmem:[#allocation2] ss:$8 sps:$4 sm:$0xff]  }
  0x36   :  { %685 = vmatprep.subr.bf16.mxu0 %v2381_v0  ;;  %v2384_v2 = vld [vmem:[#allocation2 + $0x14] ss:$8 sps:$4 sm:$0xff]   ;;  %v2386_v3 = vld [vmem:[#allocation2 + $0x10] ss:$8 sps:$4 sm:$0xff]   ;;  %v2387_v4 = vld [vmem:[#allocation2 + $0x24] ss:$8 sps:$4 sm:$0xff]  }
  0x37   :  { %686 = vmatpush1.bf16.msra.mxu0 %v2383_v1  ;;  %v2389_v5 = vld [vmem:[#allocation2 + $0x20] ss:$8 sps:$4 sm:$0xff]   ;;  %v2390_v6 = vld [vmem:[#allocation2 + $0x34] ss:$8 sps:$4 sm:$0xff]   ;;  %v2392_v7 = vld [vmem:[#allocation2 + $0x30] ss:$8 sps:$4 sm:$0xff]  }
  0x38   :  { %687 = vmatprep.subr.bf16.mxu0 %v2384_v2  ;;  %v2393_v8 = vld [vmem:[#allocation2 + $0x44] ss:$8 sps:$4 sm:$0xff]   ;;  %v2395_v9 = vld [vmem:[#allocation2 + $0x40] ss:$8 sps:$4 sm:$0xff]   ;;  %v2396_v10 = vld [vmem:[#allocation2 + $0x54] ss:$8 sps:$4 sm:$0xff]  }
  0x39   :  { %v2398_v11 = vld [vmem:[#allocation2 + $0x50] ss:$8 sps:$4 sm:$0xff]   ;;  %v2399_v12 = vld [vmem:[#allocation2 + $0x64] ss:$8 sps:$4 sm:$0xff]   ;;  %v2401_v14 = vld [vmem:[#allocation2 + $0x60] ss:$8 sps:$4 sm:$0xff]  }
  0x3a   :  { %v2431_v13 = vld [vmem:[%s2995_s0 + $0x4] ss:$24 sps:$4 sm:$0xff]   ;;  %v2404_v16 = vld [vmem:[#allocation2 + $0x70] ss:$8 sps:$4 sm:$0xff]   ;;  %v2407_v18 = vld [vmem:[#allocation2 + $0x80] ss:$8 sps:$4 sm:$0xff]  }
  0x3b   :  { %688 = vmatpush1.bf16.msra.mxu0 %v2386_v3  ;;  %v2402_v15 = vld [vmem:[#allocation2 + $0x74] ss:$8 sps:$4 sm:$0xff]   ;;  %717 = vmatprep.mubr.bf16.mxu0 %v2431_v13  ;;  %v2405_v17 = vld [vmem:[#allocation2 + $0x84] ss:$8 sps:$4 sm:$0xff]   ;;  %v2410_v20 = vld [vmem:[#allocation2 + $0x90] ss:$8 sps:$4 sm:$0xff]  }
  0x3c   :  { %689 = vmatprep.subr.bf16.mxu0 %v2387_v4  ;;  %v2408_v19 = vld [vmem:[#allocation2 + $0x94] ss:$8 sps:$4 sm:$0xff]   ;;  %v2411_v21 = vld [vmem:[#allocation2 + $0xa4] ss:$8 sps:$4 sm:$0xff]   ;;  %v2413_v22 = vld [vmem:[#allocation2 + $0xa0] ss:$8 sps:$4 sm:$0xff]  }
  0x3d   :  { %v2414_v23 = vld [vmem:[#allocation2 + $0xb4] ss:$8 sps:$4 sm:$0xff]   ;;  %v2416_v24 = vld [vmem:[#allocation2 + $0xb0] ss:$8 sps:$4 sm:$0xff]   ;;  %v2417_v25 = vld [vmem:[#allocation2 + $0xc4] ss:$8 sps:$4 sm:$0xff]  }
  0x3e   :  { %v2419_v26 = vld [vmem:[#allocation2 + $0xc0] ss:$8 sps:$4 sm:$0xff]   ;;  %v2420_v27 = vld [vmem:[#allocation2 + $0xd4] ss:$8 sps:$4 sm:$0xff]   ;;  %v2422_v28 = vld [vmem:[#allocation2 + $0xd0] ss:$8 sps:$4 sm:$0xff]  }
  0x3f   :  { %690 = vmatpush1.bf16.msra.mxu0 %v2389_v5  ;;  %v2423_v29 = vld [vmem:[#allocation2 + $0xe4] ss:$8 sps:$4 sm:$0xff]   ;;  %v2425_v30 = vld [vmem:[#allocation2 + $0xe0] ss:$8 sps:$4 sm:$0xff]   ;;  %v2426_v31 = vld [vmem:[#allocation2 + $0xf4] ss:$8 sps:$4 sm:$0xff]  }
  0x40   :  { %691 = vmatprep.subr.bf16.mxu0 %v2390_v6  ;;  %v2428_v32 = vld [vmem:[#allocation2 + $0xf0] ss:$8 sps:$4 sm:$0xff]   ;;  %v2434_v33 = vld [vmem:[#allocation2 + $0x104] ss:$8 sps:$4 sm:$0xff]   ;;  %v2432_v35 = vld [vmem:[#allocation2 + $0x100] ss:$8 sps:$4 sm:$0xff]  }
  0x41   :  { %v2429_v34 = vld [vmem:[%s2995_s0] ss:$24 sps:$4 sm:$0xff]   ;;  %v2482_v36 = vld [vmem:[%s2995_s0 + $0xc] ss:$24 sps:$4 sm:$0xff]   ;;  %v2437_v37 = vld [vmem:[#allocation2 + $0x114] ss:$8 sps:$4 sm:$0xff]  }
  0x42   :  { %v2435_v38 = vld [vmem:[#allocation2 + $0x110] ss:$8 sps:$4 sm:$0xff]   ;;  %v2440_v39 = vld [vmem:[#allocation2 + $0x124] ss:$8 sps:$4 sm:$0xff]   ;;  %v2536_v41 = vld [vmem:[#allocation4] ss:$8 sps:$4 sm:$0xff]  }
  0x43   :  { %692 = vmatpush1.bf16.msra.mxu0 %v2392_v7  ;;  %v2534_v40 = vld [vmem:[#allocation4 + $0x4] ss:$8 sps:$4 sm:$0xff]   ;;  %v2438_v42 = vld [vmem:[#allocation2 + $0x120] ss:$8 sps:$4 sm:$0xff]   ;;  %v2537_v43 = vld [vmem:[#allocation4 + $0x14] ss:$8 sps:$4 sm:$0xff]  }
  0x44   :  { %693 = vmatprep.subr.bf16.mxu0 %v2393_v8  ;;  %1025 = vmatprep.subr.bf16.mxu1 %v2534_v40  ;;  %v2443_v44 = vld [vmem:[#allocation2 + $0x134] ss:$8 sps:$4 sm:$0xff]   ;;  %v2539_v45 = vld [vmem:[#allocation4 + $0x10] ss:$8 sps:$4 sm:$0xff]   ;;  %v2540_v46 = vld [vmem:[#allocation4 + $0x24] ss:$8 sps:$4 sm:$0xff]  }
  0x45   :  { %1026 = vmatpush1.bf16.msra.mxu1 %v2536_v41  ;;  %v2441_v47 = vld [vmem:[#allocation2 + $0x130] ss:$8 sps:$4 sm:$0xff]   ;;  %v2446_v48 = vld [vmem:[#allocation2 + $0x144] ss:$8 sps:$4 sm:$0xff]   ;;  %v2542_v49 = vld [vmem:[#allocation4 + $0x20] ss:$8 sps:$4 sm:$0xff]  }
  0x46   :  { %1027 = vmatprep.subr.bf16.mxu1 %v2537_v43  ;;  %v2543_v50 = vld [vmem:[#allocation4 + $0x34] ss:$8 sps:$4 sm:$0xff]   ;;  %v2444_v51 = vld [vmem:[#allocation2 + $0x140] ss:$8 sps:$4 sm:$0xff]   ;;  %v2545_v53 = vld [vmem:[#allocation4 + $0x30] ss:$8 sps:$4 sm:$0xff]  }
  0x47   :  { %694 = vmatpush1.bf16.msra.mxu0 %v2395_v9  ;;  %v2449_v52 = vld [vmem:[#allocation2 + $0x154] ss:$8 sps:$4 sm:$0xff]   ;;  %v2546_v54 = vld [vmem:[#allocation4 + $0x44] ss:$8 sps:$4 sm:$0xff]   ;;  %v2447_v55 = vld [vmem:[#allocation2 + $0x150] ss:$8 sps:$4 sm:$0xff]  }
  0x48   :  { %695 = vmatprep.subr.bf16.mxu0 %v2396_v10  ;;  %v2452_v56 = vld [vmem:[#allocation2 + $0x164] ss:$8 sps:$4 sm:$0xff]   ;;  %v2548_v57 = vld [vmem:[#allocation4 + $0x40] ss:$8 sps:$4 sm:$0xff]   ;;  %v2549_v58 = vld [vmem:[#allocation4 + $0x54] ss:$8 sps:$4 sm:$0xff]  }
  0x49   :  { %1028 = vmatpush1.bf16.msra.mxu1 %v2539_v45  ;;  %v2450_v59 = vld [vmem:[#allocation2 + $0x160] ss:$8 sps:$4 sm:$0xff]   ;;  %v2455_v60 = vld [vmem:[#allocation2 + $0x174] ss:$8 sps:$4 sm:$0xff]   ;;  %v2551_v61 = vld [vmem:[#allocation4 + $0x50] ss:$8 sps:$4 sm:$0xff]  }
  0x4a   :  { %1029 = vmatprep.subr.bf16.mxu1 %v2540_v46  ;;  %v2552_v62 = vld [vmem:[#allocation4 + $0x64] ss:$8 sps:$4 sm:$0xff]   ;;  %v2453_v63 = vld [vmem:[#allocation2 + $0x170] ss:$8 sps:$4 sm:$0xff]   ;;  %v2554_v0 = vld [vmem:[#allocation4 + $0x60] ss:$8 sps:$4 sm:$0xff]  }
  0x4b   :  { %696 = vmatpush1.bf16.msra.mxu0 %v2398_v11  ;;  %v2458_v1 = vld [vmem:[#allocation2 + $0x184] ss:$8 sps:$4 sm:$0xff]   ;;  %v2555_v2 = vld [vmem:[#allocation4 + $0x74] ss:$8 sps:$4 sm:$0xff]   ;;  %v2456_v3 = vld [vmem:[#allocation2 + $0x180] ss:$8 sps:$4 sm:$0xff]  }
  0x4c   :  { %697 = vmatprep.subr.bf16.mxu0 %v2399_v12  ;;  %v2557_v4 = vld [vmem:[#allocation4 + $0x70] ss:$8 sps:$4 sm:$0xff]   ;;  %v2461_v5 = vld [vmem:[#allocation2 + $0x194] ss:$8 sps:$4 sm:$0xff]   ;;  %v2558_v6 = vld [vmem:[#allocation4 + $0x84] ss:$8 sps:$4 sm:$0xff]  }
  0x4d   :  { %1030 = vmatpush1.bf16.msra.mxu1 %v2542_v49  ;;  %v2459_v7 = vld [vmem:[#allocation2 + $0x190] ss:$8 sps:$4 sm:$0xff]   ;;  %v2560_v8 = vld [vmem:[#allocation4 + $0x80] ss:$8 sps:$4 sm:$0xff]   ;;  %v2464_v9 = vld [vmem:[#allocation2 + $0x1a4] ss:$8 sps:$4 sm:$0xff]  }
  0x4e   :  { %1031 = vmatprep.subr.bf16.mxu1 %v2543_v50  ;;  %v2561_v10 = vld [vmem:[#allocation4 + $0x94] ss:$8 sps:$4 sm:$0xff]   ;;  %v2462_v11 = vld [vmem:[#allocation2 + $0x1a0] ss:$8 sps:$4 sm:$0xff]   ;;  %v2563_v12 = vld [vmem:[#allocation4 + $0x90] ss:$8 sps:$4 sm:$0xff]  }
  0x4f   :  { %698 = vmatpush1.bf16.msra.mxu0 %v2401_v14  ;;  %v2467_v13 = vld [vmem:[#allocation2 + $0x1b4] ss:$8 sps:$4 sm:$0xff]   ;;  %v2564_v14 = vld [vmem:[#allocation4 + $0xa4] ss:$8 sps:$4 sm:$0xff]   ;;  %v2495_v41 = vld [vmem:[#allocation2 + $0x240] ss:$8 sps:$4 sm:$0xff]  }
  0x50   :  { %699 = vmatprep.subr.bf16.mxu0 %v2402_v15  ;;  %v2465_v15 = vld [vmem:[#allocation2 + $0x1b0] ss:$8 sps:$4 sm:$0xff]   ;;  %v2497_v40 = vld [vmem:[#allocation2 + $0x244] ss:$8 sps:$4 sm:$0xff]   ;;  %v2501_v45 = vld [vmem:[#allocation2 + $0x260] ss:$8 sps:$4 sm:$0xff]  }
  0x51   :  { %1032 = vmatpush1.bf16.msra.mxu1 %v2545_v53  ;;  %v2498_v43 = vld [vmem:[#allocation2 + $0x250] ss:$8 sps:$4 sm:$0xff]   ;;  %v2506_v46 = vld [vmem:[#allocation2 + $0x274] ss:$8 sps:$4 sm:$0xff]   ;;  %v2507_v49 = vld [vmem:[#allocation2 + $0x280] ss:$8 sps:$4 sm:$0xff]  }
  0x52   :  { %1033 = vmatprep.subr.bf16.mxu1 %v2546_v54  ;;  %v2512_v50 = vld [vmem:[#allocation2 + $0x294] ss:$8 sps:$4 sm:$0xff]   ;;  %v2513_v53 = vld [vmem:[#allocation2 + $0x2a0] ss:$8 sps:$4 sm:$0xff]  }
  0x53   :  { %700 = vmatpush1.bf16.msra.mxu0 %v2404_v16  ;;  %v2566_v16 = vld [vmem:[#allocation4 + $0xa0] ss:$8 sps:$4 sm:$0xff]   ;;  %v2518_v54 = vld [vmem:[#allocation2 + $0x2b4] ss:$8 sps:$4 sm:$0xff]  }
  0x54   :  { %701 = vmatprep.subr.bf16.mxu0 %v2405_v17  ;;  %v2470_v17 = vld [vmem:[#allocation2 + $0x1c4] ss:$8 sps:$4 sm:$0xff]  }
  0x55   :  { %1034 = vmatpush1.bf16.msra.mxu1 %v2548_v57  ;;  %v2519_v57 = vld [vmem:[#allocation2 + $0x2c0] ss:$8 sps:$4 sm:$0xff]  }
  0x56   :  { %1035 = vmatprep.subr.bf16.mxu1 %v2549_v58  ;;  %v2524_v58 = vld [vmem:[#allocation2 + $0x2d4] ss:$8 sps:$4 sm:$0xff]  }
  0x57   :  { %702 = vmatpush1.bf16.msra.mxu0 %v2407_v18  ;;  %v2567_v18 = vld [vmem:[#allocation4 + $0xb4] ss:$8 sps:$4 sm:$0xff]  }
  0x58   :  { %703 = vmatprep.subr.bf16.mxu0 %v2408_v19  ;;  %v2468_v19 = vld [vmem:[#allocation2 + $0x1c0] ss:$8 sps:$4 sm:$0xff]  }
  0x59   :  { %1036 = vmatpush1.bf16.msra.mxu1 %v2551_v61  ;;  %v2525_v61 = vld [vmem:[#allocation2 + $0x2e0] ss:$8 sps:$4 sm:$0xff]  }
  0x5a   :  { %1037 = vmatprep.subr.bf16.mxu1 %v2552_v62  ;;  %v2530_v62 = vld [vmem:[#allocation2 + $0x2f4] ss:$8 sps:$4 sm:$0xff]  }
  0x5b   :  { %704 = vmatpush1.bf16.msra.mxu0 %v2410_v20  ;;  %v2569_v20 = vld [vmem:[#allocation4 + $0xb0] ss:$8 sps:$4 sm:$0xff]  }
  0x5c   :  { %705 = vmatprep.subr.bf16.mxu0 %v2411_v21  ;;  %v2473_v21 = vld [vmem:[#allocation2 + $0x1d4] ss:$8 sps:$4 sm:$0xff]  }
  0x5d   :  { %1038 = vmatpush1.bf16.msra.mxu1 %v2554_v0  ;;  %v2531_v0 = vld [vmem:[%s2995_s0 + $0x10] ss:$24 sps:$4 sm:$0xff]  }
  0x5e   :  { %1039 = vmatprep.subr.bf16.mxu1 %v2555_v2  ;;  %v2576_v2 = vld [vmem:[#allocation4 + $0xe4] ss:$8 sps:$4 sm:$0xff]  }
  0x5f   :  { %706 = vmatpush1.bf16.msra.mxu0 %v2413_v22  ;;  %v2570_v22 = vld [vmem:[#allocation4 + $0xc4] ss:$8 sps:$4 sm:$0xff]  }
  0x60   :  { %707 = vmatprep.subr.bf16.mxu0 %v2414_v23  ;;  %v2471_v23 = vld [vmem:[#allocation2 + $0x1d0] ss:$8 sps:$4 sm:$0xff]  }
  0x61   :  { %1040 = vmatpush1.bf16.msra.mxu1 %v2557_v4  ;;  %v2579_v4 = vld [vmem:[#allocation4 + $0xf4] ss:$8 sps:$4 sm:$0xff]  }
  0x62   :  { %1041 = vmatprep.subr.bf16.mxu1 %v2558_v6  ;;  %v2584_v6 = vld [vmem:[#allocation4 + $0x104] ss:$8 sps:$4 sm:$0xff]  }
  0x63   :  { %708 = vmatpush1.bf16.msra.mxu0 %v2416_v24  ;;  %v2572_v24 = vld [vmem:[#allocation4 + $0xc0] ss:$8 sps:$4 sm:$0xff]  }
  0x64   :  { %709 = vmatprep.subr.bf16.mxu0 %v2417_v25  ;;  %v2476_v25 = vld [vmem:[#allocation2 + $0x1e4] ss:$8 sps:$4 sm:$0xff]  }
  0x65   :  { %1042 = vmatpush1.bf16.msra.mxu1 %v2560_v8 }
  0x66   :  { %1043 = vmatprep.subr.bf16.mxu1 %v2561_v10  ;;  %v163_v10 = vld [vmem:[%s2999_s4] ss:$8 sm:$0x3] }
  0x67   :  { %710 = vmatpush1.bf16.msra.mxu0 %v2419_v26  ;;  %v2573_v26 = vld [vmem:[#allocation4 + $0xd4] ss:$8 sps:$4 sm:$0xff]  }
  0x68   :  { %711 = vmatprep.subr.bf16.mxu0 %v2420_v27  ;;  %v2474_v27 = vld [vmem:[#allocation2 + $0x1e0] ss:$8 sps:$4 sm:$0xff]  }
  0x69   :  { %1044 = vmatpush1.bf16.msra.mxu1 %v2563_v12 }
  0x6a   :  { %1045 = vmatprep.subr.bf16.mxu1 %v2564_v14 }
  0x6b   :  { %712 = vmatpush1.bf16.msra.mxu0 %v2422_v28  ;;  %v2479_v28 = vld [vmem:[#allocation2 + $0x1f4] ss:$8 sps:$4 sm:$0xff]  }
  0x6c   :  { %713 = vmatprep.subr.bf16.mxu0 %v2423_v29  ;;  %v2477_v29 = vld [vmem:[#allocation2 + $0x1f0] ss:$8 sps:$4 sm:$0xff]  }
  0x6d   :  { %1046 = vmatpush1.bf16.msra.mxu1 %v2566_v16 }
  0x6e   :  { %1047 = vmatprep.subr.bf16.mxu1 %v2567_v18 }
  0x6f   :  { %714 = vmatpush1.bf16.msra.mxu0 %v2425_v30  ;;  %v2485_v30 = vld [vmem:[#allocation2 + $0x204] ss:$8 sps:$4 sm:$0xff]  }
  0x70   :  { %715 = vmatprep.subr.bf16.mxu0 %v2426_v31  ;;  %v2480_v31 = vld [vmem:[%s2995_s0 + $0x8] ss:$24 sps:$4 sm:$0xff]  }
  0x71   :  { %1048 = vmatpush1.bf16.msra.mxu1 %v2569_v20 }
  0x72   :  { %1049 = vmatprep.subr.bf16.mxu1 %v2570_v22 }
  0x73   :  { %716 = vmatpush1.bf16.msra.mxu0 %v2428_v32  ;;  %v2483_v32 = vld [vmem:[#allocation2 + $0x200] ss:$8 sps:$4 sm:$0xff]  }
  0x74   :  { %728 = vmatprep.subr.bf16.mxu0 %v2434_v33  ;;  %v2533_v33 = vld [vmem:[%s2995_s0 + $0x14] ss:$24 sps:$4 sm:$0xff]  }
  0x75   :  { %1050 = vmatpush1.bf16.msra.mxu1 %v2572_v24 }
  0x76   :  { %718 = vmatmul.mubr.bf16.vlgmr.msra.gmra.mrb[0].mxu0 %v2429_v34  ;;  %1051 = vmatprep.subr.bf16.mxu1 %v2573_v26  ;;  %v2488_v34 = vld [vmem:[#allocation2 + $0x214] ss:$8 sps:$4 sm:$0xff]  }
  0x77   :  { %729 = vmatpush1.bf16.msra.mxu0 %v2432_v35  ;;  %760 = vmatprep.mubr.bf16.mxu0 %v2482_v36  ;;  %v2486_v35 = vld [vmem:[#allocation2 + $0x210] ss:$8 sps:$4 sm:$0xff]   ;;  %v2491_v36 = vld [vmem:[#allocation2 + $0x224] ss:$8 sps:$4 sm:$0xff]  }
  0x78   :  { %730 = vmatprep.subr.bf16.mxu0 %v2437_v37  ;;  %v2489_v37 = vld [vmem:[#allocation2 + $0x220] ss:$8 sps:$4 sm:$0xff]  }
  0x7b   :  { %731 = vmatpush1.bf16.msra.mxu0 %v2435_v38  ;;  %v2494_v38 = vld [vmem:[#allocation2 + $0x234] ss:$8 sps:$4 sm:$0xff]  }
  0x7c   :  { %732 = vmatprep.subr.bf16.mxu0 %v2440_v39  ;;  %v2492_v39 = vld [vmem:[#allocation2 + $0x230] ss:$8 sps:$4 sm:$0xff]  }
  0x7f   :  { %733 = vmatpush1.bf16.msra.mxu0 %v2438_v42  ;;  %v2500_v42 = vld [vmem:[#allocation2 + $0x254] ss:$8 sps:$4 sm:$0xff]  }
  0x80   :  { %734 = vmatprep.subr.bf16.mxu0 %v2443_v44  ;;  %v2503_v44 = vld [vmem:[#allocation2 + $0x264] ss:$8 sps:$4 sm:$0xff]  }
  0x83   :  { %735 = vmatpush1.bf16.msra.mxu0 %v2441_v47  ;;  %v2504_v47 = vld [vmem:[#allocation2 + $0x270] ss:$8 sps:$4 sm:$0xff]  }
  0x84   :  { %736 = vmatprep.subr.bf16.mxu0 %v2446_v48  ;;  %v2509_v48 = vld [vmem:[#allocation2 + $0x284] ss:$8 sps:$4 sm:$0xff]  }
  0x87   :  { %737 = vmatpush1.bf16.msra.mxu0 %v2444_v51  ;;  %v2510_v51 = vld [vmem:[#allocation2 + $0x290] ss:$8 sps:$4 sm:$0xff]  }
  0x88   :  { %738 = vmatprep.subr.bf16.mxu0 %v2449_v52  ;;  %v2515_v52 = vld [vmem:[#allocation2 + $0x2a4] ss:$8 sps:$4 sm:$0xff]  }
  0x8b   :  { %739 = vmatpush1.bf16.msra.mxu0 %v2447_v55  ;;  %v2516_v55 = vld [vmem:[#allocation2 + $0x2b0] ss:$8 sps:$4 sm:$0xff]  }
  0x8c   :  { %740 = vmatprep.subr.bf16.mxu0 %v2452_v56  ;;  %v2521_v56 = vld [vmem:[#allocation2 + $0x2c4] ss:$8 sps:$4 sm:$0xff]  }
  0x8f   :  { %741 = vmatpush1.bf16.msra.mxu0 %v2450_v59  ;;  %v2522_v59 = vld [vmem:[#allocation2 + $0x2d0] ss:$8 sps:$4 sm:$0xff]  }
  0x90   :  { %742 = vmatprep.subr.bf16.mxu0 %v2455_v60  ;;  %v2527_v60 = vld [vmem:[#allocation2 + $0x2e4] ss:$8 sps:$4 sm:$0xff]  }
  0x93   :  { %743 = vmatpush1.bf16.msra.mxu0 %v2453_v63  ;;  %v2528_v63 = vld [vmem:[#allocation2 + $0x2f0] ss:$8 sps:$4 sm:$0xff]  }
  0x94   :  { %744 = vmatprep.subr.bf16.mxu0 %v2458_v1  ;;  %v2575_v1 = vld [vmem:[#allocation4 + $0xd0] ss:$8 sps:$4 sm:$0xff]  }
  0x95   :  { %1052 = vmatpush1.bf16.msra.mxu1 %v2575_v1 }
  0x96   :  { %1053 = vmatprep.subr.bf16.mxu1 %v2576_v2 }
  0x97   :  { %745 = vmatpush1.bf16.msra.mxu0 %v2456_v3  ;;  %v2578_v3 = vld [vmem:[#allocation4 + $0xe0] ss:$8 sps:$4 sm:$0xff]  }
  0x98   :  { %746 = vmatprep.subr.bf16.mxu0 %v2461_v5  ;;  %v2581_v5 = vld [vmem:[#allocation4 + $0xf0] ss:$8 sps:$4 sm:$0xff]  }
  0x99   :  { %1054 = vmatpush1.bf16.msra.mxu1 %v2578_v3 }
  0x9a   :  { %1055 = vmatprep.subr.bf16.mxu1 %v2579_v4 }
  0x9b   :  { %747 = vmatpush1.bf16.msra.mxu0 %v2459_v7  ;;  %v165_v7 = vlaneseq }
  0x9c   :  { %748 = vmatprep.subr.bf16.mxu0 %v2464_v9 }
  0x9d   :  { %1056 = vmatpush1.bf16.msra.mxu1 %v2581_v5  ;;  %v166_v8 = vshrl.u32 %v165_v7, 7 }
  0x9e   :  { %1280 = vmatprep.subr.bf16.mxu1 %v2584_v6 }
  0x9f   :  { %749 = vmatpush1.bf16.msra.mxu0 %v2462_v11  ;;  %v2949_v9 = vsub.s32 0, %v166_v8  ;;  %v2954_v11 = vsub.s32 1, %v166_v8 }
  0xa0   :  { %750 = vmatprep.subr.bf16.mxu0 %v2467_v13 }
  0xa1   :  { %v168_v12 = vrot.slane %v163_v10, %v2949_v9  ;;  %v172_v13 = vrot.slane %v163_v10, %v2954_v11 }
  0xa3   :  { %751 = vmatpush1.bf16.msra.mxu0 %v2465_v15 }
  0xa4   :  { %752 = vmatprep.subr.bf16.mxu0 %v2470_v17 }
  0xa7   :  { %753 = vmatpush1.bf16.msra.mxu0 %v2468_v19 }
  0xa8   :  { %754 = vmatprep.subr.bf16.mxu0 %v2473_v21 }
  0xab   :  { %755 = vmatpush1.bf16.msra.mxu0 %v2471_v23 }
  0xac   :  { %756 = vmatprep.subr.bf16.mxu0 %v2476_v25 }
  0xaf   :  { %757 = vmatpush1.bf16.msra.mxu0 %v2474_v27 }
  0xb0   :  { %758 = vmatprep.subr.bf16.mxu0 %v2479_v28  ;;  %v2582_v28 = vld [vmem:[#allocation4 + $0x100] ss:$8 sps:$4 sm:$0xff]  }
  0xb3   :  { %759 = vmatpush1.bf16.msra.mxu0 %v2477_v29  ;;  %v2587_v29 = vld [vmem:[#allocation4 + $0x114] ss:$8 sps:$4 sm:$0xff]  }
  0xb4   :  { %771 = vmatprep.subr.bf16.mxu0 %v2485_v30  ;;  %v2585_v30 = vld [vmem:[#allocation4 + $0x110] ss:$8 sps:$4 sm:$0xff]  }
  0xb6   :  { %761 = vmatmul.mubr.bf16.vlgmr.msra.gmra.mrb[0].mxu0 %v2480_v31  ;;  %v2590_v31 = vld [vmem:[#allocation4 + $0x124] ss:$8 sps:$4 sm:$0xff]  }
  0xb7   :  { %772 = vmatpush1.bf16.msra.mxu0 %v2483_v32  ;;  %803 = vmatprep.mubr.bf16.mxu0 %v2533_v33  ;;  %v2588_v32 = vld [vmem:[#allocation4 + $0x120] ss:$8 sps:$4 sm:$0xff]   ;;  %v2593_v33 = vld [vmem:[#allocation4 + $0x134] ss:$8 sps:$4 sm:$0xff]  }
  0xb8   :  { %773 = vmatprep.subr.bf16.mxu0 %v2488_v34  ;;  %v2591_v34 = vld [vmem:[#allocation4 + $0x130] ss:$8 sps:$4 sm:$0xff]  }
  0xbb   :  { %774 = vmatpush1.bf16.msra.mxu0 %v2486_v35  ;;  %v2596_v35 = vld [vmem:[#allocation4 + $0x144] ss:$8 sps:$4 sm:$0xff]  }
  0xbc   :  { %775 = vmatprep.subr.bf16.mxu0 %v2491_v36  ;;  %v2594_v36 = vld [vmem:[#allocation4 + $0x140] ss:$8 sps:$4 sm:$0xff]  }
  0xbf   :  { %776 = vmatpush1.bf16.msra.mxu0 %v2489_v37  ;;  %v2599_v37 = vld [vmem:[#allocation4 + $0x154] ss:$8 sps:$4 sm:$0xff]  }
  0xc0   :  { %777 = vmatprep.subr.bf16.mxu0 %v2494_v38  ;;  %v2597_v38 = vld [vmem:[#allocation4 + $0x150] ss:$8 sps:$4 sm:$0xff]  }
  0xc3   :  { %778 = vmatpush1.bf16.msra.mxu0 %v2492_v39  ;;  %v2602_v39 = vld [vmem:[#allocation4 + $0x164] ss:$8 sps:$4 sm:$0xff]  }
  0xc4   :  { %779 = vmatprep.subr.bf16.mxu0 %v2497_v40  ;;  %v2600_v40 = vld [vmem:[#allocation4 + $0x160] ss:$8 sps:$4 sm:$0xff]  }
  0xc7   :  { %780 = vmatpush1.bf16.msra.mxu0 %v2495_v41  ;;  %v2605_v41 = vld [vmem:[#allocation4 + $0x174] ss:$8 sps:$4 sm:$0xff]  }
  0xc8   :  { %781 = vmatprep.subr.bf16.mxu0 %v2500_v42  ;;  %v2603_v42 = vld [vmem:[#allocation4 + $0x170] ss:$8 sps:$4 sm:$0xff]  }
  0xcb   :  { %782 = vmatpush1.bf16.msra.mxu0 %v2498_v43  ;;  %v2608_v43 = vld [vmem:[#allocation4 + $0x184] ss:$8 sps:$4 sm:$0xff]  }
  0xcc   :  { %783 = vmatprep.subr.bf16.mxu0 %v2503_v44  ;;  %v2606_v44 = vld [vmem:[#allocation4 + $0x180] ss:$8 sps:$4 sm:$0xff]  }
  0xcf   :  { %784 = vmatpush1.bf16.msra.mxu0 %v2501_v45  ;;  %v2611_v45 = vld [vmem:[#allocation4 + $0x194] ss:$8 sps:$4 sm:$0xff]  }
  0xd0   :  { %785 = vmatprep.subr.bf16.mxu0 %v2506_v46  ;;  %v2609_v46 = vld [vmem:[#allocation4 + $0x190] ss:$8 sps:$4 sm:$0xff]  }
  0xd3   :  { %786 = vmatpush1.bf16.msra.mxu0 %v2504_v47  ;;  %v2614_v47 = vld [vmem:[#allocation4 + $0x1a4] ss:$8 sps:$4 sm:$0xff]  }
  0xd4   :  { %787 = vmatprep.subr.bf16.mxu0 %v2509_v48  ;;  %v2612_v48 = vld [vmem:[#allocation4 + $0x1a0] ss:$8 sps:$4 sm:$0xff]  }
  0xd7   :  { %788 = vmatpush1.bf16.msra.mxu0 %v2507_v49  ;;  %v2617_v49 = vld [vmem:[#allocation4 + $0x1b4] ss:$8 sps:$4 sm:$0xff]  }
  0xd8   :  { %789 = vmatprep.subr.bf16.mxu0 %v2512_v50  ;;  %v2615_v50 = vld [vmem:[#allocation4 + $0x1b0] ss:$8 sps:$4 sm:$0xff]  }
  0xdb   :  { %790 = vmatpush1.bf16.msra.mxu0 %v2510_v51  ;;  %v2620_v51 = vld [vmem:[#allocation4 + $0x1c4] ss:$8 sps:$4 sm:$0xff]  }
  0xdc   :  { %791 = vmatprep.subr.bf16.mxu0 %v2515_v52  ;;  %v2618_v52 = vld [vmem:[#allocation4 + $0x1c0] ss:$8 sps:$4 sm:$0xff]  }
  0xdf   :  { %792 = vmatpush1.bf16.msra.mxu0 %v2513_v53  ;;  %v2623_v53 = vld [vmem:[#allocation4 + $0x1d4] ss:$8 sps:$4 sm:$0xff]  }
  0xe0   :  { %793 = vmatprep.subr.bf16.mxu0 %v2518_v54  ;;  %v2621_v54 = vld [vmem:[#allocation4 + $0x1d0] ss:$8 sps:$4 sm:$0xff]  }
  0xe3   :  { %794 = vmatpush1.bf16.msra.mxu0 %v2516_v55  ;;  %v2626_v55 = vld [vmem:[#allocation4 + $0x1e4] ss:$8 sps:$4 sm:$0xff]  }
  0xe4   :  { %795 = vmatprep.subr.bf16.mxu0 %v2521_v56  ;;  %v2624_v56 = vld [vmem:[#allocation4 + $0x1e0] ss:$8 sps:$4 sm:$0xff]  }
  0xe7   :  { %796 = vmatpush1.bf16.msra.mxu0 %v2519_v57  ;;  %v2629_v57 = vld [vmem:[#allocation4 + $0x1f4] ss:$8 sps:$4 sm:$0xff]  }
  0xe8   :  { %797 = vmatprep.subr.bf16.mxu0 %v2524_v58  ;;  %v2627_v58 = vld [vmem:[#allocation4 + $0x1f0] ss:$8 sps:$4 sm:$0xff]  }
  0xeb   :  { %798 = vmatpush1.bf16.msra.mxu0 %v2522_v59  ;;  %v2632_v59 = vld [vmem:[#allocation4 + $0x204] ss:$8 sps:$4 sm:$0xff]  }
  0xec   :  { %799 = vmatprep.subr.bf16.mxu0 %v2527_v60  ;;  %v2199_v60 = vld [vmem:[%s2999_s4 + $0x1] ss:$8 sm:$0x3] }
  0xef   :  { %800 = vmatpush1.bf16.msra.mxu0 %v2525_v61  ;;  %v858_v61 = vrot.slane %v2199_v60, %v2949_v9 }
  0xf0   :  { %801 = vmatprep.subr.bf16.mxu0 %v2530_v62  ;;  %v862_v62 = vrot.slane %v2199_v60, %v2954_v11  ;;  %v2701_v60 = vld [vmem:[#allocation4 + $0x374] ss:$8 sps:$4 sm:$0xff]  }
  0xf3   :  { %802 = vmatpush1.bf16.msra.mxu0 %v2528_v63 }
  0xf6   :  { %804 = vmatmul.mubr.bf16.vlgmr.msra.gmra.mrb[0].mxu0 %v2531_v0 }
 0x1c9   :  { %v805_v14 = vpop.f32.mrb[0].mxu0 }
 0x1ca   :  { %v2364_v15 = vadd.f32 %v805_v14, %v168_v12  ;;  %v807_v16 = vpop.f32.mrb[1].mxu0 }
 0x1cb   :  { %v2365_v17 = vadd.f32 %v807_v16, %v172_v13  ;;  %v809_v18 = vpop.f32.mrb[2].mxu0  ;;  %v2635_v16 = vld [vmem:[#allocation4 + $0x214] ss:$8 sps:$4 sm:$0xff]  }
 0x1cc   :  { %v2366_v19 = vadd.f32 %v809_v18, %v168_v12  ;;  %v811_v20 = vpop.f32.mrb[3].mxu0  ;;  %v814_v22 = vmax.f32 %v2364_v15, 0.0  ;;  %v2630_v15 = vld [vmem:[#allocation4 + $0x200] ss:$8 sps:$4 sm:$0xff]   ;;  %v2638_v18 = vld [vmem:[#allocation4 + $0x224] ss:$8 sps:$4 sm:$0xff]  }
 0x1cd   :  { %v2367_v21 = vadd.f32 %v811_v20, %v172_v13  ;;  %v815_v24 = vmax.f32 %v2365_v17, 0.0  ;;  %v2633_v17 = vld [vmem:[#allocation4 + $0x210] ss:$8 sps:$4 sm:$0xff]   ;;  %v2641_v20 = vld [vmem:[#allocation4 + $0x234] ss:$8 sps:$4 sm:$0xff]  }
 0x1ce   :  { %v816_v23 = vmax.f32 %v2366_v19, 0.0  ;;  %v2636_v19 = vld [vmem:[#allocation4 + $0x220] ss:$8 sps:$4 sm:$0xff]  }
 0x1cf   :  { %v817_v25 = vmax.f32 %v2367_v21, 0.0  ;;  %v2639_v21 = vld [vmem:[#allocation4 + $0x230] ss:$8 sps:$4 sm:$0xff]  }
 0x1d0   :  { %v818_v26 = vpack.c.bf16 %v816_v23, %v814_v22  ;;  %v2644_v22 = vld [vmem:[#allocation4 + $0x244] ss:$8 sps:$4 sm:$0xff]   ;;  %v2642_v23 = vld [vmem:[#allocation4 + $0x240] ss:$8 sps:$4 sm:$0xff]  }
 0x1d1   :  { %v819_v27 = vpack.c.bf16 %v817_v25, %v815_v24  ;;  %v2647_v24 = vld [vmem:[#allocation4 + $0x254] ss:$8 sps:$4 sm:$0xff]   ;;  %v2645_v25 = vld [vmem:[#allocation4 + $0x250] ss:$8 sps:$4 sm:$0xff]  }
 0x1d3   :  { %1057 = vmatprep.mubr.bf16.mxu1 %v819_v27  ;;  %v2648_v27 = vld [vmem:[#allocation4 + $0x260] ss:$8 sps:$4 sm:$0xff]  }
 0x1d4   :  { %1058 = vmatmul.mubr.bf16.vlgmr.msra.gmra.mrb[0].mxu1 %v818_v26  ;;  %v2650_v26 = vld [vmem:[#allocation4 + $0x264] ss:$8 sps:$4 sm:$0xff]  }
 0x1d5   :  { %1281 = vmatpush1.bf16.msra.mxu1 %v2582_v28  ;;  %v2653_v28 = vld [vmem:[#allocation4 + $0x274] ss:$8 sps:$4 sm:$0xff]  }
 0x1d6   :  { %1282 = vmatprep.subr.bf16.mxu1 %v2587_v29  ;;  %v2651_v29 = vld [vmem:[#allocation4 + $0x270] ss:$8 sps:$4 sm:$0xff]  }
 0x1d9   :  { %1283 = vmatpush1.bf16.msra.mxu1 %v2585_v30  ;;  %v2656_v30 = vld [vmem:[#allocation4 + $0x284] ss:$8 sps:$4 sm:$0xff]  }
 0x1da   :  { %1284 = vmatprep.subr.bf16.mxu1 %v2590_v31  ;;  %v2654_v31 = vld [vmem:[#allocation4 + $0x280] ss:$8 sps:$4 sm:$0xff]  }
 0x1dd   :  { %1285 = vmatpush1.bf16.msra.mxu1 %v2588_v32  ;;  %v2659_v32 = vld [vmem:[#allocation4 + $0x294] ss:$8 sps:$4 sm:$0xff]  }
 0x1de   :  { %1286 = vmatprep.subr.bf16.mxu1 %v2593_v33  ;;  %v2657_v33 = vld [vmem:[#allocation4 + $0x290] ss:$8 sps:$4 sm:$0xff]  }
 0x1e1   :  { %1287 = vmatpush1.bf16.msra.mxu1 %v2591_v34  ;;  %v2662_v34 = vld [vmem:[#allocation4 + $0x2a4] ss:$8 sps:$4 sm:$0xff]  }
 0x1e2   :  { %1288 = vmatprep.subr.bf16.mxu1 %v2596_v35  ;;  %v2660_v35 = vld [vmem:[#allocation4 + $0x2a0] ss:$8 sps:$4 sm:$0xff]  }
 0x1e5   :  { %1289 = vmatpush1.bf16.msra.mxu1 %v2594_v36  ;;  %v2665_v36 = vld [vmem:[#allocation4 + $0x2b4] ss:$8 sps:$4 sm:$0xff]  }
 0x1e6   :  { %1290 = vmatprep.subr.bf16.mxu1 %v2599_v37  ;;  %v2663_v37 = vld [vmem:[#allocation4 + $0x2b0] ss:$8 sps:$4 sm:$0xff]  }
 0x1e9   :  { %1291 = vmatpush1.bf16.msra.mxu1 %v2597_v38  ;;  %v2668_v38 = vld [vmem:[#allocation4 + $0x2c4] ss:$8 sps:$4 sm:$0xff]  }
 0x1ea   :  { %1292 = vmatprep.subr.bf16.mxu1 %v2602_v39  ;;  %v2666_v39 = vld [vmem:[#allocation4 + $0x2c0] ss:$8 sps:$4 sm:$0xff]  }
 0x1ed   :  { %1293 = vmatpush1.bf16.msra.mxu1 %v2600_v40  ;;  %v2671_v40 = vld [vmem:[#allocation4 + $0x2d4] ss:$8 sps:$4 sm:$0xff]  }
 0x1ee   :  { %1294 = vmatprep.subr.bf16.mxu1 %v2605_v41  ;;  %v2669_v41 = vld [vmem:[#allocation4 + $0x2d0] ss:$8 sps:$4 sm:$0xff]  }
 0x1f1   :  { %1295 = vmatpush1.bf16.msra.mxu1 %v2603_v42  ;;  %v2674_v42 = vld [vmem:[#allocation4 + $0x2e4] ss:$8 sps:$4 sm:$0xff]  }
 0x1f2   :  { %1296 = vmatprep.subr.bf16.mxu1 %v2608_v43  ;;  %v2672_v43 = vld [vmem:[#allocation4 + $0x2e0] ss:$8 sps:$4 sm:$0xff]  }
 0x1f5   :  { %1297 = vmatpush1.bf16.msra.mxu1 %v2606_v44  ;;  %v2677_v44 = vld [vmem:[#allocation4 + $0x2f4] ss:$8 sps:$4 sm:$0xff]  }
 0x1f6   :  { %1298 = vmatprep.subr.bf16.mxu1 %v2611_v45  ;;  %v2675_v45 = vld [vmem:[#allocation4 + $0x2f0] ss:$8 sps:$4 sm:$0xff]  }
 0x1f9   :  { %1299 = vmatpush1.bf16.msra.mxu1 %v2609_v46  ;;  %v2678_v46 = vld [vmem:[#allocation4 + $0x300] ss:$8 sps:$4 sm:$0xff]  }
 0x1fa   :  { %1300 = vmatprep.subr.bf16.mxu1 %v2614_v47  ;;  %v2680_v47 = vld [vmem:[#allocation4 + $0x304] ss:$8 sps:$4 sm:$0xff]  }
 0x1fb   :  { %1790 = vmatprep.subr.bf16.mxu0 %v2680_v47  ;;  %v2749_v47 = vld [vmem:[#allocation6 + $0x74] ss:$8 sps:$4 sm:$0xff]  }
 0x1fc   :  { %1791 = vmatpush1.bf16.msra.mxu0 %v2678_v46  ;;  %v2744_v46 = vld [vmem:[#allocation6 + $0x60] ss:$8 sps:$4 sm:$0xff]  }
 0x1fd   :  { %1301 = vmatpush1.bf16.msra.mxu1 %v2612_v48  ;;  %v2683_v48 = vld [vmem:[#allocation4 + $0x314] ss:$8 sps:$4 sm:$0xff]  }
 0x1fe   :  { %1302 = vmatprep.subr.bf16.mxu1 %v2617_v49  ;;  %v2681_v49 = vld [vmem:[#allocation4 + $0x310] ss:$8 sps:$4 sm:$0xff]   ;;  %1792 = vmatprep.subr.bf16.mxu0 %v2683_v48 }
 0x1ff   :  { %v2747_v48 = vld [vmem:[#allocation6 + $0x70] ss:$8 sps:$4 sm:$0xff]  }
 0x200   :  { %1793 = vmatpush1.bf16.msra.mxu0 %v2681_v49  ;;  %v2752_v49 = vld [vmem:[#allocation6 + $0x84] ss:$8 sps:$4 sm:$0xff]  }
 0x201   :  { %1303 = vmatpush1.bf16.msra.mxu1 %v2615_v50  ;;  %v2686_v50 = vld [vmem:[#allocation4 + $0x324] ss:$8 sps:$4 sm:$0xff]  }
 0x202   :  { %1304 = vmatprep.subr.bf16.mxu1 %v2620_v51  ;;  %v2684_v51 = vld [vmem:[#allocation4 + $0x320] ss:$8 sps:$4 sm:$0xff]   ;;  %1794 = vmatprep.subr.bf16.mxu0 %v2686_v50 }
 0x203   :  { %v2750_v50 = vld [vmem:[#allocation6 + $0x80] ss:$8 sps:$4 sm:$0xff]  }
 0x204   :  { %1795 = vmatpush1.bf16.msra.mxu0 %v2684_v51  ;;  %v2755_v51 = vld [vmem:[#allocation6 + $0x94] ss:$8 sps:$4 sm:$0xff]  }
 0x205   :  { %1305 = vmatpush1.bf16.msra.mxu1 %v2618_v52  ;;  %v2689_v52 = vld [vmem:[#allocation4 + $0x334] ss:$8 sps:$4 sm:$0xff]  }
 0x206   :  { %1306 = vmatprep.subr.bf16.mxu1 %v2623_v53  ;;  %v2687_v53 = vld [vmem:[#allocation4 + $0x330] ss:$8 sps:$4 sm:$0xff]   ;;  %1796 = vmatprep.subr.bf16.mxu0 %v2689_v52 }
 0x207   :  { %v2753_v52 = vld [vmem:[#allocation6 + $0x90] ss:$8 sps:$4 sm:$0xff]  }
 0x208   :  { %1797 = vmatpush1.bf16.msra.mxu0 %v2687_v53  ;;  %v2758_v53 = vld [vmem:[#allocation6 + $0xa4] ss:$8 sps:$4 sm:$0xff]  }
 0x209   :  { %1307 = vmatpush1.bf16.msra.mxu1 %v2621_v54  ;;  %v2692_v54 = vld [vmem:[#allocation4 + $0x344] ss:$8 sps:$4 sm:$0xff]  }
 0x20a   :  { %1308 = vmatprep.subr.bf16.mxu1 %v2626_v55  ;;  %v2690_v55 = vld [vmem:[#allocation4 + $0x340] ss:$8 sps:$4 sm:$0xff]   ;;  %1798 = vmatprep.subr.bf16.mxu0 %v2692_v54 }
 0x20b   :  { %v2756_v54 = vld [vmem:[#allocation6 + $0xa0] ss:$8 sps:$4 sm:$0xff]  }
 0x20c   :  { %1799 = vmatpush1.bf16.msra.mxu0 %v2690_v55  ;;  %v2761_v55 = vld [vmem:[#allocation6 + $0xb4] ss:$8 sps:$4 sm:$0xff]  }
 0x20d   :  { %1309 = vmatpush1.bf16.msra.mxu1 %v2624_v56  ;;  %v2695_v56 = vld [vmem:[#allocation4 + $0x354] ss:$8 sps:$4 sm:$0xff]  }
 0x20e   :  { %1310 = vmatprep.subr.bf16.mxu1 %v2629_v57  ;;  %v2693_v57 = vld [vmem:[#allocation4 + $0x350] ss:$8 sps:$4 sm:$0xff]   ;;  %1800 = vmatprep.subr.bf16.mxu0 %v2695_v56 }
 0x20f   :  { %v2759_v56 = vld [vmem:[#allocation6 + $0xb0] ss:$8 sps:$4 sm:$0xff]  }
 0x210   :  { %1801 = vmatpush1.bf16.msra.mxu0 %v2693_v57  ;;  %v2764_v57 = vld [vmem:[#allocation6 + $0xc4] ss:$8 sps:$4 sm:$0xff]  }
 0x211   :  { %1311 = vmatpush1.bf16.msra.mxu1 %v2627_v58  ;;  %v2698_v58 = vld [vmem:[#allocation4 + $0x364] ss:$8 sps:$4 sm:$0xff]  }
 0x212   :  { %1535 = vmatprep.subr.bf16.mxu1 %v2632_v59  ;;  %v2696_v59 = vld [vmem:[#allocation4 + $0x360] ss:$8 sps:$4 sm:$0xff]   ;;  %1802 = vmatprep.subr.bf16.mxu0 %v2698_v58 }
 0x213   :  { %v2762_v58 = vld [vmem:[#allocation6 + $0xc0] ss:$8 sps:$4 sm:$0xff]  }
 0x214   :  { %1803 = vmatpush1.bf16.msra.mxu0 %v2696_v59  ;;  %v2767_v59 = vld [vmem:[#allocation6 + $0xd4] ss:$8 sps:$4 sm:$0xff]  }
 0x215   :  { %1804 = vmatprep.subr.bf16.mxu0 %v2701_v60  ;;  %v2765_v60 = vld [vmem:[#allocation6 + $0xd0] ss:$8 sps:$4 sm:$0xff]  }
 0x2a7   :  { %v1059_v63 = vpop.f32.mrb[0].mxu1 }
 0x2a8   :  { %v1060_v0 = vadd.f32 %v1059_v63, %v858_v61  ;;  %v1061_v1 = vpop.f32.mrb[1].mxu1  ;;  %v2702_v63 = vld [vmem:[#allocation4 + $0x380] ss:$8 sps:$4 sm:$0xff]  }
 0x2a9   :  { %v1062_v2 = vadd.f32 %v1061_v1, %v862_v62  ;;  %v1063_v3 = vpop.f32.mrb[2].mxu1  ;;  %v2705_v1 = vld [vmem:[#allocation4 + $0x390] ss:$8 sps:$4 sm:$0xff]  }
 0x2aa   :  { %v1064_v4 = vadd.f32 %v1063_v3, %v858_v61  ;;  %v1065_v5 = vpop.f32.mrb[3].mxu1  ;;  %v1068_v7 = vmax.f32 %v1060_v0, 0.0  ;;  %v2699_v61 = vld [vmem:[#allocation4 + $0x370] ss:$8 sps:$4 sm:$0xff]   ;;  %v2707_v0 = vld [vmem:[#allocation4 + $0x394] ss:$8 sps:$4 sm:$0xff]  }
 0x2ab   :  { %v1066_v6 = vadd.f32 %v1065_v5, %v862_v62  ;;  %v1069_v10 = vmax.f32 %v1062_v2, 0.0  ;;  %v2704_v62 = vld [vmem:[#allocation4 + $0x384] ss:$8 sps:$4 sm:$0xff]   ;;  %1805 = vmatpush1.bf16.msra.mxu0 %v2699_v61  ;;  %v2708_v3 = vld [vmem:[#allocation4 + $0x3a0] ss:$8 sps:$4 sm:$0xff]  }
 0x2ac   :  { %v1070_v8 = vmax.f32 %v1064_v4, 0.0  ;;  %1806 = vmatprep.subr.bf16.mxu0 %v2704_v62  ;;  %v2710_v2 = vld [vmem:[#allocation4 + $0x3a4] ss:$8 sps:$4 sm:$0xff]   ;;  %v2713_v4 = vld [vmem:[#allocation4 + $0x3b4] ss:$8 sps:$4 sm:$0xff]  }
 0x2ad   :  { %v1071_v12 = vmax.f32 %v1066_v6, 0.0  ;;  %v2711_v5 = vld [vmem:[#allocation4 + $0x3b0] ss:$8 sps:$4 sm:$0xff]   ;;  %v2716_v6 = vld [vmem:[#allocation4 + $0x3c4] ss:$8 sps:$4 sm:$0xff]  }
 0x2ae   :  { %v1072_v13 = vpack.c.bf16 %v1070_v8, %v1068_v7  ;;  %v2714_v7 = vld [vmem:[#allocation4 + $0x3c0] ss:$8 sps:$4 sm:$0xff]   ;;  %v2719_v8 = vld [vmem:[#allocation4 + $0x3d4] ss:$8 sps:$4 sm:$0xff]  }
 0x2af   :  { %v1073_v14 = vpack.c.bf16 %v1071_v12, %v1069_v10  ;;  %1807 = vmatpush1.bf16.msra.mxu0 %v2702_v63  ;;  %v2717_v10 = vld [vmem:[#allocation4 + $0x3d0] ss:$8 sps:$4 sm:$0xff]   ;;  %v2232_v12 = vld [vmem:[%s2999_s4 + $0x2] ss:$8 sm:$0x3] }
 0x2b0   :  { %1808 = vmatprep.subr.bf16.mxu0 %v2707_v0  ;;  %v2265_v61 = vld [vmem:[%s2999_s4 + $0x3] ss:$8 sm:$0x3] }
 0x2b1   :  { %1312 = vmatprep.mubr.bf16.mxu1 %v1073_v14  ;;  %v1117_v14 = vrot.slane %v2232_v12, %v2954_v11  ;;  %v1368_v62 = vrot.slane %v2265_v61, %v2949_v9  ;;  %v1372_v63 = vrot.slane %v2265_v61, %v2954_v11 }
 0x2b2   :  { %1313 = vmatmul.mubr.bf16.vlgmr.msra.gmra.mrb[4].mxu1 %v1072_v13  ;;  %v1113_v13 = vrot.slane %v2232_v12, %v2949_v9 }
 0x2b3   :  { %1536 = vmatpush1.bf16.msra.mxu1 %v2630_v15  ;;  %1809 = vmatpush1.bf16.msra.mxu0 %v2705_v1 }
 0x2b4   :  { %1537 = vmatprep.subr.bf16.mxu1 %v2635_v16  ;;  %1810 = vmatprep.subr.bf16.mxu0 %v2710_v2 }
 0x2b7   :  { %1538 = vmatpush1.bf16.msra.mxu1 %v2633_v17  ;;  %1811 = vmatpush1.bf16.msra.mxu0 %v2708_v3 }
 0x2b8   :  { %1539 = vmatprep.subr.bf16.mxu1 %v2638_v18  ;;  %1812 = vmatprep.subr.bf16.mxu0 %v2713_v4 }
 0x2bb   :  { %1540 = vmatpush1.bf16.msra.mxu1 %v2636_v19  ;;  %1813 = vmatpush1.bf16.msra.mxu0 %v2711_v5 }
 0x2bc   :  { %1541 = vmatprep.subr.bf16.mxu1 %v2641_v20  ;;  %1814 = vmatprep.subr.bf16.mxu0 %v2716_v6 }
 0x2bf   :  { %1542 = vmatpush1.bf16.msra.mxu1 %v2639_v21  ;;  %1815 = vmatpush1.bf16.msra.mxu0 %v2714_v7 }
 0x2c0   :  { %1543 = vmatprep.subr.bf16.mxu1 %v2644_v22  ;;  %1816 = vmatprep.subr.bf16.mxu0 %v2719_v8 }
 0x2c3   :  { %1544 = vmatpush1.bf16.msra.mxu1 %v2642_v23  ;;  %1817 = vmatpush1.bf16.msra.mxu0 %v2717_v10 }
 0x2c4   :  { %1545 = vmatprep.subr.bf16.mxu1 %v2647_v24 }
 0x2c7   :  { %1546 = vmatpush1.bf16.msra.mxu1 %v2645_v25 }
 0x2c8   :  { %1547 = vmatprep.subr.bf16.mxu1 %v2650_v26 }
 0x2cb   :  { %1548 = vmatpush1.bf16.msra.mxu1 %v2648_v27 }
 0x2cc   :  { %1549 = vmatprep.subr.bf16.mxu1 %v2653_v28 }
 0x2cf   :  { %1550 = vmatpush1.bf16.msra.mxu1 %v2651_v29  ;;  %v2722_v29 = vld [vmem:[#allocation4 + $0x3e4] ss:$8 sps:$4 sm:$0xff]  }
 0x2d0   :  { %1551 = vmatprep.subr.bf16.mxu1 %v2656_v30  ;;  %v2720_v30 = vld [vmem:[#allocation4 + $0x3e0] ss:$8 sps:$4 sm:$0xff]   ;;  %1818 = vmatprep.subr.bf16.mxu0 %v2722_v29 }
 0x2d1   :  { %1819 = vmatpush1.bf16.msra.mxu0 %v2720_v30 }
 0x2d3   :  { %1552 = vmatpush1.bf16.msra.mxu1 %v2654_v31  ;;  %v2725_v31 = vld [vmem:[#allocation4 + $0x3f4] ss:$8 sps:$4 sm:$0xff]  }
 0x2d4   :  { %1553 = vmatprep.subr.bf16.mxu1 %v2659_v32  ;;  %v2723_v32 = vld [vmem:[#allocation4 + $0x3f0] ss:$8 sps:$4 sm:$0xff]   ;;  %1820 = vmatprep.subr.bf16.mxu0 %v2725_v31 }
 0x2d5   :  { %1821 = vmatpush1.bf16.msra.mxu0 %v2723_v32 }
 0x2d7   :  { %1554 = vmatpush1.bf16.msra.mxu1 %v2657_v33  ;;  %v2726_v33 = vld [vmem:[#allocation6] ss:$8 sps:$4 sm:$0xff]  }
 0x2d8   :  { %1555 = vmatprep.subr.bf16.mxu1 %v2662_v34  ;;  %v2728_v34 = vld [vmem:[#allocation6 + $0x4] ss:$8 sps:$4 sm:$0xff]  }
 0x2db   :  { %1556 = vmatpush1.bf16.msra.mxu1 %v2660_v35  ;;  %v2731_v35 = vld [vmem:[#allocation6 + $0x14] ss:$8 sps:$4 sm:$0xff]  }
 0x2dc   :  { %1557 = vmatprep.subr.bf16.mxu1 %v2665_v36  ;;  %v2729_v36 = vld [vmem:[#allocation6 + $0x10] ss:$8 sps:$4 sm:$0xff]  }
 0x2df   :  { %1558 = vmatpush1.bf16.msra.mxu1 %v2663_v37  ;;  %v2734_v37 = vld [vmem:[#allocation6 + $0x24] ss:$8 sps:$4 sm:$0xff]  }
 0x2e0   :  { %1559 = vmatprep.subr.bf16.mxu1 %v2668_v38  ;;  %v2732_v38 = vld [vmem:[#allocation6 + $0x20] ss:$8 sps:$4 sm:$0xff]  }
 0x2e3   :  { %1560 = vmatpush1.bf16.msra.mxu1 %v2666_v39  ;;  %v2737_v39 = vld [vmem:[#allocation6 + $0x34] ss:$8 sps:$4 sm:$0xff]  }
 0x2e4   :  { %1561 = vmatprep.subr.bf16.mxu1 %v2671_v40  ;;  %v2735_v40 = vld [vmem:[#allocation6 + $0x30] ss:$8 sps:$4 sm:$0xff]  }
 0x2e7   :  { %1562 = vmatpush1.bf16.msra.mxu1 %v2669_v41  ;;  %v2740_v41 = vld [vmem:[#allocation6 + $0x44] ss:$8 sps:$4 sm:$0xff]  }
 0x2e8   :  { %1563 = vmatprep.subr.bf16.mxu1 %v2674_v42  ;;  %v2738_v42 = vld [vmem:[#allocation6 + $0x40] ss:$8 sps:$4 sm:$0xff]  }
 0x2eb   :  { %1564 = vmatpush1.bf16.msra.mxu1 %v2672_v43  ;;  %v2743_v43 = vld [vmem:[#allocation6 + $0x54] ss:$8 sps:$4 sm:$0xff]  }
 0x2ec   :  { %1565 = vmatprep.subr.bf16.mxu1 %v2677_v44  ;;  %v2741_v44 = vld [vmem:[#allocation6 + $0x50] ss:$8 sps:$4 sm:$0xff]  }
 0x2ef   :  { %1566 = vmatpush1.bf16.msra.mxu1 %v2675_v45  ;;  %v2746_v45 = vld [vmem:[#allocation6 + $0x64] ss:$8 sps:$4 sm:$0xff]  }
 0x2f0   :  { %2044 = vmatprep.subr.bf16.mxu1 %v2728_v34 }
 0x385   :  { %v1314_v15 = vpop.f32.mrb[4].mxu1 }
 0x386   :  { %v1315_v16 = vadd.f32 %v1314_v15, %v1113_v13  ;;  %v1316_v17 = vpop.f32.mrb[5].mxu1 }
 0x387   :  { %v1317_v18 = vadd.f32 %v1316_v17, %v1117_v14  ;;  %v1318_v19 = vpop.f32.mrb[6].mxu1  ;;  %v2768_v17 = vld [vmem:[#allocation6 + $0xe0] ss:$8 sps:$4 sm:$0xff]  }
 0x388   :  { %v1319_v20 = vadd.f32 %v1318_v19, %v1113_v13  ;;  %v1320_v21 = vpop.f32.mrb[7].mxu1  ;;  %v1323_v23 = vmax.f32 %v1315_v16, 0.0  ;;  %v2770_v16 = vld [vmem:[#allocation6 + $0xe4] ss:$8 sps:$4 sm:$0xff]   ;;  %v2771_v19 = vld [vmem:[#allocation6 + $0xf0] ss:$8 sps:$4 sm:$0xff]  }
 0x389   :  { %v1321_v22 = vadd.f32 %v1320_v21, %v1117_v14  ;;  %v1324_v25 = vmax.f32 %v1317_v18, 0.0  ;;  %v2773_v18 = vld [vmem:[#allocation6 + $0xf4] ss:$8 sps:$4 sm:$0xff]  }
 0x38a   :  { %v1325_v24 = vmax.f32 %v1319_v20, 0.0  ;;  %v2298_v20 = vld [vmem:[%s2999_s4 + $0x4] ss:$8 sm:$0x3] }
 0x38b   :  { %v1326_v26 = vmax.f32 %v1321_v22, 0.0  ;;  %v1623_v21 = vrot.slane %v2298_v20, %v2949_v9  ;;  %v1627_v22 = vrot.slane %v2298_v20, %v2954_v11 }
 0x38c   :  { %v1327_v27 = vpack.c.bf16 %v1325_v24, %v1323_v23 }
 0x38d   :  { %v1328_v28 = vpack.c.bf16 %v1326_v26, %v1324_v25 }
 0x38f   :  { %1567 = vmatprep.mubr.bf16.mxu1 %v1328_v28 }
 0x390   :  { %1568 = vmatmul.mubr.bf16.vlgmr.msra.gmra.mrb[8].mxu1 %v1327_v27 }
 0x391   :  { %2045 = vmatpush1.bf16.msra.mxu1 %v2726_v33 }
 0x392   :  { %2046 = vmatprep.subr.bf16.mxu1 %v2731_v35 }
 0x395   :  { %2047 = vmatpush1.bf16.msra.mxu1 %v2729_v36 }
 0x396   :  { %2048 = vmatprep.subr.bf16.mxu1 %v2734_v37  ;;  %v2331_v37 = vld [vmem:[%s2999_s4 + $0x5] ss:$8 sm:$0x3] }
 0x399   :  { %2049 = vmatpush1.bf16.msra.mxu1 %v2732_v38  ;;  %v1877_v38 = vrot.slane %v2331_v37, %v2949_v9 }
 0x39a   :  { %2050 = vmatprep.subr.bf16.mxu1 %v2737_v39  ;;  %v1881_v39 = vrot.slane %v2331_v37, %v2954_v11 }
 0x39d   :  { %2051 = vmatpush1.bf16.msra.mxu1 %v2735_v40 }
 0x39e   :  { %2052 = vmatprep.subr.bf16.mxu1 %v2740_v41 }
 0x3a1   :  { %2053 = vmatpush1.bf16.msra.mxu1 %v2738_v42 }
 0x3a2   :  { %2054 = vmatprep.subr.bf16.mxu1 %v2743_v43 }
 0x3a5   :  { %2055 = vmatpush1.bf16.msra.mxu1 %v2741_v44 }
 0x3a6   :  { %2056 = vmatprep.subr.bf16.mxu1 %v2746_v45 }
 0x3a9   :  { %2057 = vmatpush1.bf16.msra.mxu1 %v2744_v46 }
 0x3aa   :  { %2058 = vmatprep.subr.bf16.mxu1 %v2749_v47 }
 0x3ad   :  { %2059 = vmatpush1.bf16.msra.mxu1 %v2747_v48 }
 0x3ae   :  { %2060 = vmatprep.subr.bf16.mxu1 %v2752_v49 }
 0x3b1   :  { %2061 = vmatpush1.bf16.msra.mxu1 %v2750_v50 }
 0x3b2   :  { %2062 = vmatprep.subr.bf16.mxu1 %v2755_v51 }
 0x3b5   :  { %2063 = vmatpush1.bf16.msra.mxu1 %v2753_v52 }
 0x3b6   :  { %2064 = vmatprep.subr.bf16.mxu1 %v2758_v53 }
 0x3b9   :  { %2065 = vmatpush1.bf16.msra.mxu1 %v2756_v54 }
 0x3ba   :  { %2066 = vmatprep.subr.bf16.mxu1 %v2761_v55 }
 0x3bd   :  { %2067 = vmatpush1.bf16.msra.mxu1 %v2759_v56 }
 0x3be   :  { %2068 = vmatprep.subr.bf16.mxu1 %v2764_v57 }
 0x3c1   :  { %2069 = vmatpush1.bf16.msra.mxu1 %v2762_v58 }
 0x3c2   :  { %2070 = vmatprep.subr.bf16.mxu1 %v2767_v59 }
 0x3c5   :  { %2071 = vmatpush1.bf16.msra.mxu1 %v2765_v60 }
 0x3c6   :  { %2072 = vmatprep.subr.bf16.mxu1 %v2770_v16 }
 0x3c9   :  { %2073 = vmatpush1.bf16.msra.mxu1 %v2768_v17 }
 0x3ca   :  { %2074 = vmatprep.subr.bf16.mxu1 %v2773_v18 }
 0x3cd   :  { %2075 = vmatpush1.bf16.msra.mxu1 %v2771_v19 }
 0x463   :  { %v1569_v0 = vpop.f32.mrb[8].mxu1 }
 0x464   :  { %v1570_v1 = vadd.f32 %v1569_v0, %v1368_v62  ;;  %v1571_v2 = vpop.f32.mrb[9].mxu1 }
 0x465   :  { %v1572_v3 = vadd.f32 %v1571_v2, %v1372_v63  ;;  %v1573_v4 = vpop.f32.mrb[10].mxu1 }
 0x466   :  { %v1574_v5 = vadd.f32 %v1573_v4, %v1368_v62  ;;  %v1575_v6 = vpop.f32.mrb[11].mxu1  ;;  %v1578_v8 = vmax.f32 %v1570_v1, 0.0 }
 0x467   :  { %v1576_v7 = vadd.f32 %v1575_v6, %v1372_v63  ;;  %v1579_v12 = vmax.f32 %v1572_v3, 0.0 }
 0x468   :  { %v1580_v10 = vmax.f32 %v1574_v5, 0.0 }
 0x469   :  { %v1581_v13 = vmax.f32 %v1576_v7, 0.0 }
 0x46a   :  { %v1582_v14 = vpack.c.bf16 %v1580_v10, %v1578_v8 }
 0x46b   :  { %v1583_v15 = vpack.c.bf16 %v1581_v13, %v1579_v12 }
 0x46d   :  { %1822 = vmatprep.mubr.bf16.mxu0 %v1583_v15 }
 0x46e   :  { %1823 = vmatmul.mubr.bf16.vlgmr.msra.gmra.mrb[4].mxu0 %v1582_v14 }
 0x541   :  { %v1824_v23 = vpop.f32.mrb[4].mxu0 }
 0x542   :  { %v1825_v24 = vadd.f32 %v1824_v23, %v1623_v21  ;;  %v1826_v25 = vpop.f32.mrb[5].mxu0 }
 0x543   :  { %v1827_v26 = vadd.f32 %v1826_v25, %v1627_v22  ;;  %v1828_v27 = vpop.f32.mrb[6].mxu0 }
 0x544   :  { %v1829_v28 = vadd.f32 %v1828_v27, %v1623_v21  ;;  %v1830_v29 = vpop.f32.mrb[7].mxu0  ;;  %v1833_v31 = vmax.f32 %v1825_v24, 0.0 }
 0x545   :  { %v1831_v30 = vadd.f32 %v1830_v29, %v1627_v22  ;;  %v1834_v33 = vmax.f32 %v1827_v26, 0.0 }
 0x546   :  { %v1835_v32 = vmax.f32 %v1829_v28, 0.0 }
 0x547   :  { %v1836_v34 = vmax.f32 %v1831_v30, 0.0 }
 0x548   :  { %v1837_v35 = vpack.c.bf16 %v1835_v32, %v1833_v31 }
 0x549   :  { %v1838_v36 = vpack.c.bf16 %v1836_v34, %v1834_v33 }
 0x54b   :  { %2076 = vmatprep.mubr.bf16.mxu1 %v1838_v36 }
 0x54c   :  { %2077 = vmatmul.mubr.bf16.vlgmr.msra.gmra.mrb[12].mxu1 %v1837_v35 }
 0x61f   :  { %v2078_v40 = vpop.f32.mrb[12].mxu1 }
 0x620   :  { %v2079_v41 = vadd.f32 %v2078_v40, %v1877_v38  ;;  %v2080_v42 = vpop.f32.mrb[13].mxu1 }
 0x621   :  { %v2081_v43 = vadd.f32 %v2080_v42, %v1881_v39  ;;  %v2082_v44 = vpop.f32.mrb[14].mxu1 }
 0x622   :  { %2087 = vst [vmem:[%s3000_s5] sm:$0xff] %v2079_v41  ;;  %v2083_v45 = vadd.f32 %v2082_v44, %v1877_v38  ;;  %v2084_v46 = vpop.f32.mrb[15].mxu1 }
 0x623   :  { %2088 = vst [vmem:[%s3000_s5 + $0x8] sm:$0xff] %v2081_v43  ;;  %v2085_v47 = vadd.f32 %v2084_v46, %v1881_v39 }
 0x624   :  { %2089 = vst [vmem:[%s3000_s5 + $0x10] sm:$0xff] %v2083_v45 }
 0x625   :  { %2090 = vst [vmem:[%s3000_s5 + $0x18] sm:$0xff] %v2085_v47 }
 0x626   :  { %2095 = vsyncpa [#allocation3], 1 }
 0x627   :  { %2096 = vsyncpa [#allocation5], 1 }

</bundles_post_ra>
